<compile_context>
chip_gen: v7x
topology: tpu7x:2x2x1
jax: 0.10.0
libtpu: 0.0.40
codegen_flags: <defaults>
</compile_context>

<pallas_src>
import jax
import jax.numpy as jnp
from jax.experimental import pallas as pl
from jax.experimental.pallas import tpu as pltpu


def _scale_kernel(x_ref, m_ref, o_ref):
    # x_ref: (tr, tc) tile of the flattened (N*C, H*W) input.
    # m_ref: (tr, 1) per-row (== per (n, c)) multiplier; broadcast along lanes.
    o_ref[...] = x_ref[...] * m_ref[...]


def _choose_tiles(rows, cols, itemsize):
    """Pick a lane-dense block whose double-buffered VMEM footprint
    (x block x2 + out block x2 + tiny multiplier) stays around ~8 MiB
    (safe for v5e's 16 MiB scoped default and v7x's smaller VMEM) while
    being large enough to amortise the ~0.35 us/step pipeline overhead."""
    pack = {4: 8, 2: 16, 1: 32}.get(itemsize, 8)      # sublane packing per dtype
    target_elems = (2 * 1024 * 1024) // itemsize       # ~2 MiB per x block
    # Column tile: each row is contiguous in HBM -> prefer the full extent
    # (long DMA bursts, fully lane-dense unmasked stores); else a big
    # multiple of 128.
    if cols <= 128 or cols * pack <= target_elems:
        tc = cols
    else:
        tc = max(128, (target_elems // pack) // 128 * 128)
        tc = min(tc, (cols // 128) * 128)
    # Row tile: fill the remaining budget, multiple of the sublane pack
    # (or the full extent, which is always legal).
    tr = max(pack, (target_elems // max(tc, 1)) // pack * pack)
    if tr >= rows:
        tr = rows
    return tr, tc


def all_or_nothing_pruner_forward(x, pruner_weight, *, threshold=0.75,
                                  activated=True, min_pallas_elems=1 << 18):
    """Pallas equivalent of AllOrNothingPruner.forward for NCHW input x."""
    if not activated:
        # Non-activated path is an identity (DIFFERENTIATE_TENSOR is False).
        return x

    N, C, H, W = x.shape
    w = pruner_weight.reshape(-1).astype(jnp.float32)          # (C,)
    mean = jnp.mean(w)
    s = 1.0 / (1.0 + jnp.exp(-100.0 * mean + 86.0))            # sigmoid(mean, 100, 86)
    mask = (mean > threshold).astype(jnp.float32)               # all-or-nothing scalar
    m = (mask * s * w).astype(x.dtype)                          # (C,) per-channel multipliers

    rows, cols = N * C, H * W
    total = rows * cols
    if total < min_pallas_elems:
        # Small-tensor bypass: kernel launch + pipeline prologue would dominate;
        # let XLA fuse the elementwise multiply instead.
        return x * m.reshape(1, C, 1, 1)

    # Zero-copy reshapes: NCHW is contiguous per (n, c), so (N*C, H*W) keeps the
    # broadcast structure (one multiplier per row) and gives a lane-dense slab.
    x2 = x.reshape(rows, cols)
    m_rows = jnp.broadcast_to(m.reshape(1, C), (N, C)).reshape(rows, 1)

    tr, tc = _choose_tiles(rows, cols, jnp.dtype(x.dtype).itemsize)
    # cdiv grid: partial edge blocks are fine for an elementwise op (OOB region
    # of the output block is discarded) -- no jnp.pad / out[:total] round trips.
    grid = (pl.cdiv(rows, tr), pl.cdiv(cols, tc))

    out2 = pl.pallas_call(
        _scale_kernel,
        out_shape=jax.ShapeDtypeStruct((rows, cols), x.dtype),
        grid=grid,
        in_specs=[pl.BlockSpec((tr, tc), lambda i, j: (i, j)),
                  pl.BlockSpec((tr, 1), lambda i, j: (i, 0))],
        out_specs=pl.BlockSpec((tr, tc), lambda i, j: (i, j)),
        compiler_params=pltpu.CompilerParams(
            dimension_semantics=("parallel", "parallel")),
    )(x2, m_rows)
    return out2.reshape(N, C, H, W)


if __name__ == "__main__":
    key = jax.random.PRNGKey(0)
    kx, kw = jax.random.split(key)
    N, C, H, W = 2, 4, 16, 16
    x = jax.random.normal(kx, (N, C, H, W), dtype=jnp.float32)
    # adjustment_mode(): pruner_weight = 1 - U[0,1) * 0.01  -> mean > threshold
    pruner_weight = 1.0 - jax.random.uniform(kw, (1, C, 1, 1), dtype=jnp.float32) * 0.01

    # min_pallas_elems=0 forces the Pallas path even at this small demo shape.
    out = all_or_nothing_pruner_forward(x, pruner_weight, min_pallas_elems=0)
    out = jax.block_until_ready(out)

    # Pure-JAX reference of AllOrNothingPruner.forward (activated=True).
    wf = pruner_weight.astype(jnp.float32)
    mean = jnp.mean(wf)
    s = 1.0 / (1.0 + jnp.exp(-100.0 * mean + 86.0))
    mask = (mean > 0.75).astype(jnp.float32)
    ref = x * (mask * s * wf)                                   # broadcast (1, C, 1, 1)

    assert out.shape == x.shape
    assert jnp.allclose(out, ref, atol=1e-6, rtol=1e-6), "mismatch vs reference"
    print("KERNEL_OK")
</pallas_src>

<mosaic_0001>
module attributes {stable_mosaic.version = 11 : i64} {
  func.func @_scale_kernel(%arg0: i32, %arg1: i32, %arg2: memref<8x256xf32, #tpu.memory_space<vmem>>, %arg3: memref<8x1xf32, #tpu.memory_space<vmem>>, %arg4: memref<8x256xf32, #tpu.memory_space<vmem>>) attributes {dimension_semantics = [#tpu.dimension_semantics<parallel>, #tpu.dimension_semantics<parallel>], iteration_bounds = array<i64: 1, 1>, scalar_prefetch = 0 : i64, scratch_operands = 0 : i64, tpu.core_type = #tpu.core_type<tc>, window_params = [{transform_indices = @transform_0, window_bounds = array<i64: 8, 256>}, {transform_indices = @transform_1, window_bounds = array<i64: 8, 1>}, {transform_indices = @transform_2, window_bounds = array<i64: 8, 256>}]} {
    %c0 = arith.constant 0 : index
    %c0_0 = arith.constant 0 : index
    %0 = vector.load %arg2[%c0, %c0_0] : memref<8x256xf32, #tpu.memory_space<vmem>>, vector<8x256xf32>
    %c0_1 = arith.constant 0 : index
    %c0_2 = arith.constant 0 : index
    %1 = vector.load %arg3[%c0_1, %c0_2] : memref<8x1xf32, #tpu.memory_space<vmem>>, vector<8x1xf32>
    %2 = vector.broadcast %1 : vector<8x1xf32> to vector<8x256xf32>
    %3 = arith.mulf %0, %2 : vector<8x256xf32>
    %c0_3 = arith.constant 0 : index
    %c0_4 = arith.constant 0 : index
    %4 = vector.load %arg4[%c0_3, %c0_4] : memref<8x256xf32, #tpu.memory_space<vmem>>, vector<8x256xf32>
    tpu.vector_store %arg4[%c0_3, %c0_4], %3 {strides = array<i32>} : memref<8x256xf32, #tpu.memory_space<vmem>>, vector<8x256xf32>,
    return
  }
  func.func @transform_0(%arg0: i32, %arg1: i32) -> (i32, i32) {
    %c0_i32 = arith.constant 0 : i32
    return %arg0, %arg1 : i32, i32
  }
  func.func @transform_1(%arg0: i32, %arg1: i32) -> (i32, i32) {
    %c0_i32 = arith.constant 0 : i32
    %c0_i32_0 = arith.constant 0 : i32
    return %arg0, %c0_i32 : i32, i32
  }
  func.func @transform_2(%arg0: i32, %arg1: i32) -> (i32, i32) {
    %c0_i32 = arith.constant 0 : i32
    return %arg0, %arg1 : i32, i32
  }
}

</mosaic_0001>

<bundles_post_ra>
// kernel: tpu_custom_call.1
= control target key start
LH: loop header
LB: loop body
LE: loop exit
PB: predicated region body
PF: predicated region fallthrough
CT: control target
= control target key end

     0   :  { %7 = vsyncpa [#allocation3], 0  ;;  %s148_s0 = inlined_call_operand.hbm [shape: f32[8,256], index: 0, kind: input, shape index: {}]   ;;  %s149_s1 = inlined_call_operand.vmem [shape: f32[8,1], index: 1, kind: input, shape index: {}]   ;;  %s150_s2 = inlined_call_operand.hbm [shape: f32[8,256], index: 2, kind: output, shape index: {}]  }
   0x1   :  { %8 = vsyncpa [#allocation4], 0  ;;  %s103_s9 = smov [#allocation2]   ;;  %s55_s13 = scalar_lea.hbm %s148_s0, 256 }
   0x2   :  { %s15_s10 = sshll.u32 %s103_s9, 4  ;;  %p56_p0 = scmp.ne.s32.totalorder %s148_s0, %s55_s13  ;;  %s16_s10 = int_to_ptr.vmem [resolvable:$true] %s15_s10 }
   0x3   :  { %p59_p1 = scmp.lt.u32.totalorder %s55_s13, %s148_s0 }
   0x5   :  { %p61_p2 = pnand %p59_p1, %p56_p0 }
   0x7   :  { %64 = shalt.err (!%p61_p2)
}
   0x8   :  { %s65_s18 = scalar_lea.vmem %s16_s10, 256  ;;  %p70_p4 = scmp.lt.s32.totalorder %s16_s10, %s16_s10 }
   0x9   :  { %p66_p3 = scmp.ne.s32.totalorder %s16_s10, %s65_s18  ;;  %p71_p5 = scmp.lt.s32.totalorder %s65_s18, %s65_s18 }
   0xb   :  { %p72_p6 = por %p71_p5, %p70_p4 }
   0xd   :  { %p73_p7 = pnand %p72_p6, %p66_p3 }
   0xf   :  { %76 = shalt.err (!%p73_p7)
}
  0x10   :  { %18 = dma.hbm_to_vmem [thread:$0]  %s148_s0, 256, %s16_s10, [#allocation3]  }
  0x11   :  { %99 = dma.done.wait [#allocation3], 256  }
  0x12   :  { %100 = vsyncadd [#allocation3], 4294967040  ;;  %v104_v0 = vmov 0   ;;  %v26_v1 = vld [vmem:[%s149_s1] sm:$0xff]  ;;  %v25_v3 = vld [vmem:[#allocation2 + $0x8] sm:$0xff]  ;;  %s105_s23 = smov [#allocation5]  }
  0x13   :  { %54 = vset.pattern.permute.xlu0 %v104_v0  ;;  %v24_v2 = vld [vmem:[#allocation2] sm:$0xff]  ;;  %s42_s24 = sshll.u32 %s105_s23, 4  ;;  %s43_s24 = int_to_ptr.vmem [resolvable:$true] %s42_s24 }
  0x14   :  { %29 = vperm.xlu0 %54, %v26_v1   ;;  %s77_s0 = scalar_lea.vmem %s43_s24, 256  ;;  %p82_p9 = scmp.lt.s32.totalorder %s43_s24, %s43_s24 }
  0x15   :  { %p78_p8 = scmp.ne.s32.totalorder %s43_s24, %s77_s0  ;;  %p83_p10 = scmp.lt.s32.totalorder %s77_s0, %s77_s0 }
  0x17   :  { %p84_p11 = por %p83_p10, %p82_p9 }
  0x19   :  { %p85_p12 = pnand %p84_p11, %p78_p8 }
  0x93   :  { %v30_v4 = vpop.permute.xlu0 %29 }
  0x94   :  { %v32_v5 = vmul.f32 %v30_v4, %v24_v2  ;;  %v33_v6 = vmul.f32 %v30_v4, %v25_v3 }
  0x96   :  { %34 = vst [vmem:[#allocation5] sm:$0xff] %v32_v5  ;;  %35 = vst [vmem:[#allocation5 + $0x8] sm:$0xff] %v33_v6 }
  0x97   :  { %88 = shalt.err (!%p85_p12)
}
  0x98   :  { %s89_s26 = scalar_lea.hbm %s150_s2, 256 }
  0x99   :  { %p90_p13 = scmp.ne.s32.totalorder %s150_s2, %s89_s26  ;;  %p93_p0 = scmp.lt.u32.totalorder %s89_s26, %s150_s2 }
  0x9b   :  { %p95_p1 = pnand %p93_p0, %p90_p13 }
  0x9d   :  { %98 = shalt.err (!%p95_p1)
}
  0x9e   :  { %45 = dma.vmem_to_hbm [thread:$0]  %s43_s24, 256, %s150_s2, [#allocation4]  }
  0x9f   :  { %101 = dma.done.wait [#allocation4], 256  }
  0xa0   :  { %102 = vsyncadd [#allocation4], 4294967040 }
  0xa1   :  { %49 = vsyncpa [#allocation3], 1 }
  0xa2   :  { %50 = vsyncpa [#allocation4], 1 }

</bundles_post_ra>
